<compile_context>
chip_gen: v6e
topology: v6e:2x2x1
jax: 0.10.0
libtpu: 0.0.40
codegen_flags: <defaults>
</compile_context>

<pallas_src>
import jax
import jax.numpy as jnp
from jax.experimental import pallas as pl
from jax.experimental.pallas import tpu as pltpu

LANES = 1024           # lane-dense last dim (multiple of 128)
MAX_BLK_ROWS = 1024    # 1024 x 1024 f32 = 4 MiB per tile


def _g_kernel(a_ref, b_ref, x_ref, o_ref):
    # a_ref: SMEM (2,), b_ref: SMEM (1,), x_ref/o_ref: VMEM (blk_rows, LANES)
    x = x_ref[...]
    a0 = a_ref[0]
    a1 = a_ref[1]
    b = b_ref[0]
    # [x, x^2] @ a + b  ==  x*a0 + x^2*a1 + b  ==  x*(a0 + x*a1) + b  (Horner)
    o_ref[...] = x * (a0 + x * a1) + b


def linear_g_pallas(x, a, b):
    """x: (N, 1) f32, a: (2, 1) f32, b: (1,) f32 -> (N, 1) f32."""
    N = x.shape[0]

    # --- parameters as SMEM scalars (casts are no-ops if already f32) ---
    a_s = a.reshape(2).astype(jnp.float32)
    b_s = b.reshape(1).astype(jnp.float32)

    # --- lane-dense reshape: (N, 1) -> (rows_padded, LANES) ---
    x_flat = x.reshape(-1).astype(jnp.float32)
    total = x_flat.shape[0]

    rows = pl.cdiv(total, LANES)
    blk_rows = min(MAX_BLK_ROWS, rows)
    rows_padded = pl.cdiv(rows, blk_rows) * blk_rows
    padded_total = rows_padded * LANES
    if padded_total != total:
        x_flat = jnp.pad(x_flat, (0, padded_total - total))
    x2d = x_flat.reshape(rows_padded, LANES)

    grid = (rows_padded // blk_rows,)

    out2d = pl.pallas_call(
        _g_kernel,
        out_shape=jax.ShapeDtypeStruct((rows_padded, LANES), jnp.float32),
        grid=grid,
        in_specs=[
            pl.BlockSpec(memory_space=pltpu.SMEM),               # a (2,)
            pl.BlockSpec(memory_space=pltpu.SMEM),               # b (1,)
            pl.BlockSpec((blk_rows, LANES), lambda i: (i, 0)),    # x tile
        ],
        out_specs=pl.BlockSpec((blk_rows, LANES), lambda i: (i, 0)),
        compiler_params=pltpu.CompilerParams(
            dimension_semantics=("parallel",),
            vmem_limit_bytes=32 << 20,
        ),
    )(a_s, b_s, x2d)

    # drop padded tail and restore (N, 1)
    return out2d.reshape(-1)[:total].reshape(N, 1)


def linear_g_ref(x, a, b):
    x_expanded = jnp.concatenate([x, x ** 2], axis=1)
    return jnp.matmul(x_expanded, a) + b


if __name__ == "__main__":
    key = jax.random.PRNGKey(0)
    k_a, k_b, k_x1, k_x2 = jax.random.split(key, 4)

    # Deterministic parameter init (mirrors Model.initialize() -> normal_)
    a = jax.random.normal(k_a, (2, 1), dtype=jnp.float32)
    b = jax.random.normal(k_b, (1,), dtype=jnp.float32)

    # Small input consistent with forward: (batch=8, features=1)
    x_small = jax.random.normal(k_x1, (8, 1), dtype=jnp.float32)
    out_small = jax.block_until_ready(linear_g_pallas(x_small, a, b))
    ref_small = linear_g_ref(x_small, a, b)
    assert out_small.shape == (8, 1)
    assert jnp.allclose(out_small, ref_small, atol=1e-5, rtol=1e-5)

    # A non-multiple-of-1024 batch to exercise padding + lane-dense tiling.
    x_mid = jax.random.normal(k_x2, (3000, 1), dtype=jnp.float32)
    out_mid = jax.block_until_ready(linear_g_pallas(x_mid, a, b))
    ref_mid = linear_g_ref(x_mid, a, b)
    assert out_mid.shape == (3000, 1)
    assert jnp.allclose(out_mid, ref_mid, atol=1e-5, rtol=1e-5)

    print("KERNEL_OK")
</pallas_src>

<mosaic_0001>
module attributes {stable_mosaic.version = 11 : i64} {
  func.func @_g_kernel(%arg0: i32, %arg1: memref<2xf32, #tpu.memory_space<smem>>, %arg2: memref<1xf32, #tpu.memory_space<smem>>, %arg3: memref<1x1024xf32, #tpu.memory_space<vmem>>, %arg4: memref<1x1024xf32, #tpu.memory_space<vmem>>) attributes {dimension_semantics = [#tpu.dimension_semantics<parallel>], iteration_bounds = array<i64: 1>, scalar_prefetch = 0 : i64, scratch_operands = 0 : i64, tpu.core_type = #tpu.core_type<tc>, window_params = [{transform_indices = @transform_0, window_bounds = array<i64: 2>}, {transform_indices = @transform_1, window_bounds = array<i64: 1>}, {transform_indices = @transform_2, window_bounds = array<i64: 1, 1024>}, {transform_indices = @transform_3, window_bounds = array<i64: 1, 1024>}]} {
    %c0 = arith.constant 0 : index
    %c0_0 = arith.constant 0 : index
    %0 = vector.load %arg3[%c0, %c0_0] : memref<1x1024xf32, #tpu.memory_space<vmem>>, vector<1x1024xf32>
    %c0_1 = arith.constant 0 : index
    %1 = memref.load %arg1[%c0_1] : memref<2xf32, #tpu.memory_space<smem>>
    %c1 = arith.constant 1 : index
    %2 = memref.load %arg1[%c1] : memref<2xf32, #tpu.memory_space<smem>>
    %c0_2 = arith.constant 0 : index
    %3 = memref.load %arg2[%c0_2] : memref<1xf32, #tpu.memory_space<smem>>
    %4 = vector.broadcast %2 : f32 to vector<1x1024xf32>
    %5 = arith.mulf %0, %4 : vector<1x1024xf32>
    %6 = vector.broadcast %1 : f32 to vector<1x1024xf32>
    %7 = arith.addf %6, %5 : vector<1x1024xf32>
    %8 = arith.mulf %0, %7 : vector<1x1024xf32>
    %9 = vector.broadcast %3 : f32 to vector<1x1024xf32>
    %10 = arith.addf %8, %9 : vector<1x1024xf32>
    %c0_3 = arith.constant 0 : index
    %c0_4 = arith.constant 0 : index
    %11 = vector.load %arg4[%c0_3, %c0_4] : memref<1x1024xf32, #tpu.memory_space<vmem>>, vector<1x1024xf32>
    tpu.vector_store %arg4[%c0_3, %c0_4], %10 {strides = array<i32>} : memref<1x1024xf32, #tpu.memory_space<vmem>>, vector<1x1024xf32>,
    return
  }
  func.func @transform_0(%arg0: i32) -> i32 {
    %c0_i32 = arith.constant 0 : i32
    %c0_i32_0 = arith.constant 0 : i32
    return %c0_i32 : i32
  }
  func.func @transform_1(%arg0: i32) -> i32 {
    %c0_i32 = arith.constant 0 : i32
    %c0_i32_0 = arith.constant 0 : i32
    return %c0_i32 : i32
  }
  func.func @transform_2(%arg0: i32) -> (i32, i32) {
    %c0_i32 = arith.constant 0 : i32
    %c0_i32_0 = arith.constant 0 : i32
    return %arg0, %c0_i32 : i32, i32
  }
  func.func @transform_3(%arg0: i32) -> (i32, i32) {
    %c0_i32 = arith.constant 0 : i32
    %c0_i32_0 = arith.constant 0 : i32
    return %arg0, %c0_i32 : i32, i32
  }
}

</mosaic_0001>

<bundles_post_ra>
// kernel: tpu_custom_call.1
= control target key start
LH: loop header
LB: loop body
LE: loop exit
PB: predicated region body
PF: predicated region fallthrough
CT: control target
= control target key end

     0   :  { %9 = vsyncpa [#allocation6], 0  ;;  %s166_s0 = inlined_call_operand.vmem [shape: f32[2], index: 0, kind: input, shape index: {}]   ;;  %s167_s1 = inlined_call_operand.<no memory space> [shape: f32[1], index: 1, kind: input, shape index: {}]   ;;  %s168_s2 = inlined_call_operand.hbm [shape: f32[1,1024], index: 2, kind: input, shape index: {}]   ;;  %s169_s3 = inlined_call_operand.hbm [shape: f32[1,1024], index: 3, kind: output, shape index: {}]  }
   0x1   :  { %10 = vsyncpa [#allocation4], 0 }
   0x2   :  { %11 = vsyncpa [#allocation5], 0  ;;  %s18_s14 = sshll.u32 %s166_s0, 4  ;;  %s19_s14 = int_to_ptr.vmem [resolvable:$true] %s18_s14 }
   0x3   :  { %s73_s15 = scalar_lea.vmem %s19_s14, 16  ;;  %p78_p1 = scmp.lt.s32.totalorder %s19_s14, %s19_s14 }
   0x4   :  { %p74_p0 = scmp.ne.s32.totalorder %s19_s14, %s73_s15  ;;  %p79_p2 = scmp.lt.s32.totalorder %s73_s15, %s73_s15 }
   0x6   :  { %p80_p3 = por %p79_p2, %p78_p1 }
   0x8   :  { %p81_p4 = pnand %p80_p3, %p74_p0 }
   0xa   :  { %84 = shalt.err (!%p81_p4)
}
   0xb   :  { %s131_s16 = smov [#allocation3]   ;;  %s132_s17 = smov [#allocation7]  }
   0xc   :  { %21 = dma.vmem_to_smem %s19_s14, 16, %s131_s16, [#allocation6]  }
   0xd   :  { %s30_s18 = sshll.u32 %s132_s17, 4  ;;  %s31_s18 = int_to_ptr.vmem [resolvable:$true] %s30_s18 }
   0xe   :  { %s93_s19 = scalar_lea.vmem %s31_s18, 128  ;;  %p98_p6 = scmp.lt.s32.totalorder %s31_s18, %s31_s18 }
   0xf   :  { %p94_p5 = scmp.ne.s32.totalorder %s31_s18, %s93_s19  ;;  %p99_p7 = scmp.lt.s32.totalorder %s93_s19, %s93_s19 }
  0x11   :  { %p100_p8 = por %p99_p7, %p98_p6 }
  0x13   :  { %p101_p9 = pnand %p100_p8, %p94_p5 }
  0x15   :  { %104 = shalt.err (!%p101_p9)
}
  0x16   :  { %33 = dma.hbm_to_vmem [thread:$0]  %s168_s2, 128, %s31_s18, [#allocation4]  }
  0x17   :  { %125 = dma.done.wait [#allocation6], 16  }
  0x18   :  { %126 = vsyncadd [#allocation6], 4294967280 }
  0x19   :  { %127 = dma.done.wait [#allocation4], 128  }
  0x1a   :  { %128 = vsyncadd [#allocation4], 4294967168 }
  0x1b   :  { %40 = sfence }
  0x1c   :  { %s42_s21 = sld [smem:[#allocation3]]  ;;  %v41_v0 = vld [vmem:[#allocation7] sm:$0xff]  ;;  %v50_v5 = vstv %s167_s1  ;;  %s133_s25 = smov [#allocation8]  }
  0x1d   :  { %s69_s22 = sld [smem:[#allocation3 + $0x1]]  ;;  %s59_s26 = sshll.u32 %s133_s25, 4  ;;  %s60_s26 = int_to_ptr.vmem [resolvable:$true] %s59_s26 }
  0x1e   :  { %s105_s2 = scalar_lea.vmem %s60_s26, 128  ;;  %p110_p11 = scmp.lt.s32.totalorder %s60_s26, %s60_s26 }
  0x1f   :  { %p106_p10 = scmp.ne.s32.totalorder %s60_s26, %s105_s2  ;;  %p111_p12 = scmp.lt.s32.totalorder %s105_s2, %s105_s2 }
  0x21   :  { %p112_p13 = por %p111_p12, %p110_p11 }
  0x22   :  { %v47_v2 = vstv %s42_s21 }
  0x23   :  { %v45_v1 = vstv %s69_s22  ;;  %p113_p0 = pnand %p112_p13, %p106_p10 }
  0x24   :  { %v46_v3 = vmul.f32 %v45_v1, %v41_v0 }
  0x26   :  { %v48_v4 = vadd.f32 %v47_v2, %v46_v3 }
  0x28   :  { %v49_v6 = vmul.f32 %v48_v4, %v41_v0 }
  0x2a   :  { %v51_v7 = vadd.f32 %v50_v5, %v49_v6 }
  0x2c   :  { %52 = vst [vmem:[#allocation8] sm:$0xff] %v51_v7 }
  0x2d   :  { %116 = shalt.err (!%p113_p0)
}
  0x2e   :  { %62 = dma.vmem_to_hbm [thread:$0]  %s60_s26, 128, %s169_s3, [#allocation5]  }
  0x2f   :  { %129 = dma.done.wait [#allocation5], 128  }
  0x30   :  { %130 = vsyncadd [#allocation5], 4294967168 }
  0x31   :  { %66 = vsyncpa [#allocation4], 1 }
  0x32   :  { %67 = vsyncpa [#allocation5], 1 }
  0x33   :  { %68 = vsyncpa [#allocation6], 1 }

</bundles_post_ra>
